<compile_context>
chip_gen: v5e
topology: v5e:2x2
jax: 0.10.0
libtpu: 0.0.40
codegen_flags: <defaults>
</compile_context>

<pallas_src>
import functools
import math

import jax
import jax.numpy as jnp
from jax.experimental import pallas as pl
from jax.experimental.pallas import tpu as pltpu

_LANES = 128


def _dice_partial_kernel(p_ref, t_ref, num_ref, den_ref, *,
                         block_k, tail_valid, needs_mask):
    """Accumulate lane-wise partial sums of p*t and p^2 + t^2 per sub-row.

    Grid is (batch_blocks, feature_blocks); the feature axis (last) is the
    reduction axis, so the (block_n, 128) outputs act as resident
    accumulators across it (zero-init on k == 0).
    """
    k = pl.program_id(1)

    @pl.when(k == 0)
    def _():
        num_ref[...] = jnp.zeros_like(num_ref)
        den_ref[...] = jnp.zeros_like(den_ref)

    p = p_ref[...].astype(jnp.float32)
    t = t_ref[...].astype(jnp.float32)

    if needs_mask:
        # Only the last feature block is ragged; everything past `tail_valid`
        # in that block is out-of-bounds garbage and must be zeroed.
        limit = jnp.where(k == pl.num_programs(1) - 1, tail_valid, block_k)
        lane = jax.lax.broadcasted_iota(jnp.int32, p.shape, 1)
        keep = lane < limit
        p = jnp.where(keep, p, 0.0)
        t = jnp.where(keep, t, 0.0)

    # Lane-wise accumulation: stay on the VPU (128-wide vreg-aligned chunks);
    # the single cross-lane (XLU-style) reduce happens once outside the
    # kernel on a tiny [rows, 128] array.
    bn = p.shape[0]
    num_part = jnp.zeros((bn, _LANES), jnp.float32)
    den_part = jnp.zeros((bn, _LANES), jnp.float32)
    for j in range(block_k // _LANES):                # static, unrolled
        pj = p[:, j * _LANES:(j + 1) * _LANES]
        tj = t[:, j * _LANES:(j + 1) * _LANES]
        num_part = num_part + pj * tj
        den_part = den_part + pj * pj + tj * tj

    num_ref[...] += num_part
    den_ref[...] += den_part


def _round_up(x, m):
    return ((x + m - 1) // m) * m


def _pick_packing(n, d):
    """Sub-row packing factor R so that N*R fills the 8 sublanes (if D allows)."""
    r = 8 // math.gcd(n, 8)
    while r > 1 and d % r != 0:
        r //= 2
    return r


def _pick_block_n(rows):
    if rows % 8 != 0:
        return rows                     # full dim -> exempt from (8, .) rule
    bn = min(rows, 256)
    bn -= bn % 8
    while rows % bn != 0:               # terminates at 8 (divides rows)
        bn -= 8
    return bn


def binary_dice_loss(predict, target, smooth=1.0, p=2, reduction="mean"):
    assert predict.shape[0] == target.shape[0], \
        "predict & target batch size don't match"
    assert p == 2, "kernel specialized for p=2 (module default)"

    n = predict.shape[0]
    d = 1
    for s in predict.shape[1:]:
        d *= s

    # Sublane packing: split each sample's row into R contiguous sub-rows.
    r = _pick_packing(n, d)
    rows = n * r
    d_eff = d // r
    pred2d = predict.reshape(rows, d_eff)
    targ2d = target.reshape(rows, d_eff)

    block_n = _pick_block_n(rows)

    # Feature-axis tile: as large as the VMEM budget allows (mem-bound
    # streaming kernel), multiple of 128 lanes, no host-side padding.
    itemsize = jnp.dtype(pred2d.dtype).itemsize
    tile_budget_bytes = 32 * 1024 * 1024          # 2 inputs x 2 pipeline bufs
    max_bk = tile_budget_bytes // (4 * block_n * itemsize)
    max_bk = max(_LANES, (max_bk // _LANES) * _LANES)
    block_k = min(_round_up(d_eff, _LANES), max_bk, 8192)

    grid_n = pl.cdiv(rows, block_n)
    grid_k = pl.cdiv(d_eff, block_k)
    tail_valid = d_eff - (grid_k - 1) * block_k
    needs_mask = tail_valid != block_k

    kernel = functools.partial(
        _dice_partial_kernel,
        block_k=block_k, tail_valid=tail_valid, needs_mask=needs_mask)

    cost = pl.CostEstimate(
        flops=6 * n * d,
        transcendentals=0,
        bytes_accessed=2 * n * d * itemsize + 2 * rows * _LANES * 4,
    )

    num_lanes, den_lanes = pl.pallas_call(
        kernel,
        out_shape=(
            jax.ShapeDtypeStruct((rows, _LANES), jnp.float32),
            jax.ShapeDtypeStruct((rows, _LANES), jnp.float32),
        ),
        grid_spec=pltpu.PrefetchScalarGridSpec(
            num_scalar_prefetch=0,
            grid=(grid_n, grid_k),
            in_specs=[
                pl.BlockSpec((block_n, block_k), lambda i, k: (i, k)),
                pl.BlockSpec((block_n, block_k), lambda i, k: (i, k)),
            ],
            out_specs=(
                pl.BlockSpec((block_n, _LANES), lambda i, k: (i, 0)),
                pl.BlockSpec((block_n, _LANES), lambda i, k: (i, 0)),
            ),
        ),
        compiler_params=pltpu.CompilerParams(
            dimension_semantics=("parallel", "arbitrary"),
            vmem_limit_bytes=48 * 1024 * 1024,
        ),
        cost_estimate=cost,
    )(pred2d, targ2d)

    # Tiny glue: fold the 128 lane partials and the R sub-rows per sample,
    # then apply the dice formula and the batch reduction.
    num = jnp.sum(num_lanes.reshape(n, -1), axis=1)
    den = jnp.sum(den_lanes.reshape(n, -1), axis=1)
    loss = 1.0 - (num + smooth) / (den + smooth)

    if reduction == "mean":
        return jnp.mean(loss)
    elif reduction == "sum":
        return jnp.sum(loss)
    elif reduction == "none":
        return loss
    else:
        raise Exception("Unexpected reduction {}".format(reduction))


def _reference(predict, target, smooth=1.0):
    pred2d = predict.reshape(predict.shape[0], -1).astype(jnp.float32)
    targ2d = target.reshape(target.shape[0], -1).astype(jnp.float32)
    num = jnp.sum(pred2d * targ2d, axis=1) + smooth
    den = jnp.sum(pred2d ** 2 + targ2d ** 2, axis=1) + smooth
    return jnp.mean(1.0 - num / den)


if __name__ == "__main__":
    key = jax.random.PRNGKey(0)
    k1, k2 = jax.random.split(key)

    # NCHW inputs, consistent with a typical segmentation head.
    n, c, h, w = 2, 4, 16, 16
    predict = jax.nn.sigmoid(jax.random.normal(k1, (n, c, h, w), jnp.float32))
    target = (jax.random.uniform(k2, (n, c, h, w)) > 0.5).astype(jnp.float32)

    out = binary_dice_loss(predict, target, smooth=1.0, p=2, reduction="mean")
    out = jax.block_until_ready(out)

    ref = _reference(predict, target, smooth=1.0)
    assert jnp.allclose(out, ref, atol=1e-5, rtol=1e-5), (out, ref)

    print("KERNEL_OK")
</pallas_src>

<mosaic_0001>
module attributes {stable_mosaic.version = 11 : i64} {
  func.func @_dice_partial_kernel(%arg0: i32, %arg1: i32, %arg2: memref<8x256xf32, #tpu.memory_space<vmem>>, %arg3: memref<8x256xf32, #tpu.memory_space<vmem>>, %arg4: memref<8x128xf32, #tpu.memory_space<vmem>>, %arg5: memref<8x128xf32, #tpu.memory_space<vmem>>) attributes {dimension_semantics = [#tpu.dimension_semantics<parallel>, #tpu.dimension_semantics<arbitrary>], iteration_bounds = array<i64: 1, 1>, scalar_prefetch = 0 : i64, scratch_operands = 0 : i64, tpu.core_type = #tpu.core_type<tc>, window_params = [{transform_indices = @transform_0, window_bounds = array<i64: 8, 256>}, {transform_indices = @transform_1, window_bounds = array<i64: 8, 256>}, {transform_indices = @transform_2, window_bounds = array<i64: 8, 128>}, {transform_indices = @transform_3, window_bounds = array<i64: 8, 128>}]} {
    %c0_i32 = arith.constant 0 : i32
    %0 = arith.cmpi eq, %arg1, %c0_i32 : i32
    %1 = arith.extui %0 : i1 to i32
    %c0_i32_0 = arith.constant 0 : i32
    %2 = arith.cmpi ne, %1, %c0_i32_0 : i32
    scf.if %2 {
      %cst_13 = arith.constant 0.000000e+00 : f32
      %29 = vector.broadcast %cst_13 : f32 to vector<8x128xf32>
      %c0_14 = arith.constant 0 : index
      %c0_15 = arith.constant 0 : index
      %30 = vector.load %arg4[%c0_14, %c0_15] : memref<8x128xf32, #tpu.memory_space<vmem>>, vector<8x128xf32>
      tpu.vector_store %arg4[%c0_14, %c0_15], %29 {strides = array<i32>} : memref<8x128xf32, #tpu.memory_space<vmem>>, vector<8x128xf32>,
      %cst_16 = arith.constant 0.000000e+00 : f32
      %31 = vector.broadcast %cst_16 : f32 to vector<8x128xf32>
      %c0_17 = arith.constant 0 : index
      %c0_18 = arith.constant 0 : index
      %32 = vector.load %arg5[%c0_17, %c0_18] : memref<8x128xf32, #tpu.memory_space<vmem>>, vector<8x128xf32>
      tpu.vector_store %arg5[%c0_17, %c0_18], %31 {strides = array<i32>} : memref<8x128xf32, #tpu.memory_space<vmem>>, vector<8x128xf32>,
    } else {
    }
    %c0 = arith.constant 0 : index
    %c0_1 = arith.constant 0 : index
    %3 = vector.load %arg2[%c0, %c0_1] : memref<8x256xf32, #tpu.memory_space<vmem>>, vector<8x256xf32>
    %c0_2 = arith.constant 0 : index
    %c0_3 = arith.constant 0 : index
    %4 = vector.load %arg3[%c0_2, %c0_3] : memref<8x256xf32, #tpu.memory_space<vmem>>, vector<8x256xf32>
    %cst = arith.constant 0.000000e+00 : f32
    %5 = vector.broadcast %cst : f32 to vector<8x128xf32>
    %cst_4 = arith.constant 0.000000e+00 : f32
    %6 = vector.broadcast %cst_4 : f32 to vector<8x128xf32>
    %7 = vector.extract_strided_slice %3 {offsets = [0, 0], sizes = [8, 128], strides = [1, 1]} : vector<8x256xf32> to vector<8x128xf32>
    %8 = vector.extract_strided_slice %4 {offsets = [0, 0], sizes = [8, 128], strides = [1, 1]} : vector<8x256xf32> to vector<8x128xf32>
    %9 = arith.mulf %7, %8 : vector<8x128xf32>
    %10 = arith.addf %5, %9 : vector<8x128xf32>
    %11 = arith.mulf %7, %7 : vector<8x128xf32>
    %12 = arith.addf %6, %11 : vector<8x128xf32>
    %13 = arith.mulf %8, %8 : vector<8x128xf32>
    %14 = arith.addf %12, %13 : vector<8x128xf32>
    %15 = vector.extract_strided_slice %3 {offsets = [0, 128], sizes = [8, 128], strides = [1, 1]} : vector<8x256xf32> to vector<8x128xf32>
    %16 = vector.extract_strided_slice %4 {offsets = [0, 128], sizes = [8, 128], strides = [1, 1]} : vector<8x256xf32> to vector<8x128xf32>
    %17 = arith.mulf %15, %16 : vector<8x128xf32>
    %18 = arith.addf %10, %17 : vector<8x128xf32>
    %19 = arith.mulf %15, %15 : vector<8x128xf32>
    %20 = arith.addf %14, %19 : vector<8x128xf32>
    %21 = arith.mulf %16, %16 : vector<8x128xf32>
    %22 = arith.addf %20, %21 : vector<8x128xf32>
    %c0_5 = arith.constant 0 : index
    %c0_6 = arith.constant 0 : index
    %23 = vector.load %arg4[%c0_5, %c0_6] : memref<8x128xf32, #tpu.memory_space<vmem>>, vector<8x128xf32>
    %24 = arith.addf %23, %18 : vector<8x128xf32>
    %c0_7 = arith.constant 0 : index
    %c0_8 = arith.constant 0 : index
    %25 = vector.load %arg4[%c0_7, %c0_8] : memref<8x128xf32, #tpu.memory_space<vmem>>, vector<8x128xf32>
    tpu.vector_store %arg4[%c0_7, %c0_8], %24 {strides = array<i32>} : memref<8x128xf32, #tpu.memory_space<vmem>>, vector<8x128xf32>,
    %c0_9 = arith.constant 0 : index
    %c0_10 = arith.constant 0 : index
    %26 = vector.load %arg5[%c0_9, %c0_10] : memref<8x128xf32, #tpu.memory_space<vmem>>, vector<8x128xf32>
    %27 = arith.addf %26, %22 : vector<8x128xf32>
    %c0_11 = arith.constant 0 : index
    %c0_12 = arith.constant 0 : index
    %28 = vector.load %arg5[%c0_11, %c0_12] : memref<8x128xf32, #tpu.memory_space<vmem>>, vector<8x128xf32>
    tpu.vector_store %arg5[%c0_11, %c0_12], %27 {strides = array<i32>} : memref<8x128xf32, #tpu.memory_space<vmem>>, vector<8x128xf32>,
    return
  }
  func.func @transform_0(%arg0: i32, %arg1: i32) -> (i32, i32) {
    %c0_i32 = arith.constant 0 : i32
    return %arg0, %arg1 : i32, i32
  }
  func.func @transform_1(%arg0: i32, %arg1: i32) -> (i32, i32) {
    %c0_i32 = arith.constant 0 : i32
    return %arg0, %arg1 : i32, i32
  }
  func.func @transform_2(%arg0: i32, %arg1: i32) -> (i32, i32) {
    %c0_i32 = arith.constant 0 : i32
    %c0_i32_0 = arith.constant 0 : i32
    return %arg0, %c0_i32 : i32, i32
  }
  func.func @transform_3(%arg0: i32, %arg1: i32) -> (i32, i32) {
    %c0_i32 = arith.constant 0 : i32
    %c0_i32_0 = arith.constant 0 : i32
    return %arg0, %c0_i32 : i32, i32
  }
}

</mosaic_0001>

<bundles_post_ra>
// kernel: tpu_custom_call.1
= control target key start
LH: loop header
LB: loop body
LE: loop exit
PB: predicated region body
PF: predicated region fallthrough
CT: control target
= control target key end

     0   :  { %9 = vsyncpa [#allocation3], 0  ;;  %s250_s0 = inlined_call_operand.hbm [shape: f32[8,256], index: 0, kind: input, shape index: {}]   ;;  %s251_s1 = inlined_call_operand.hbm [shape: f32[8,256], index: 1, kind: input, shape index: {}]   ;;  %s252_s2 = inlined_call_operand.hbm [shape: f32[8,128], index: 2, kind: output, shape index: {0}]   ;;  %s253_s3 = inlined_call_operand.hbm [shape: f32[8,128], index: 3, kind: output, shape index: {1}]  }
   0x1   :  { %10 = vsyncpa [#allocation6], 0 }
   0x2   :  { %11 = vsyncpa [#allocation4], 0 }
   0x3   :  { %12 = vsyncpa [#allocation9], 0  ;;  %s18_s14 = sshll.u32 %s250_s0, 4  ;;  %s214_s15 = smov [#allocation2]   ;;  %s19_s14 = int_to_ptr.hbm [resolvable:$true] %s18_s14 }
   0x4   :  { %s20_s16 = sshll.u32 %s214_s15, 4  ;;  %s29_s19 = sshll.u32 %s251_s1, 4  ;;  %s21_s16 = int_to_ptr.vmem [resolvable:$true] %s20_s16  ;;  %s30_s19 = int_to_ptr.hbm [resolvable:$true] %s29_s19 }
   0x5   :  { %23 = dma.hbm_to_vmem [thread:$0]  %s19_s14, 256, %s21_s16, [#allocation3]  }
   0x6   :  { %s215_s20 = smov [#allocation5]  }
   0x7   :  { %s31_s21 = sshll.u32 %s215_s20, 4  ;;  %s32_s21 = int_to_ptr.vmem [resolvable:$true] %s31_s21 }
   0x8   :  { %34 = dma.hbm_to_vmem [thread:$0]  %s30_s19, 256, %s32_s21, [#allocation6]  }
   0x9   :  { %206 = dma.done.wait [#allocation3], 256  }
   0xa   :  { %207 = vsyncadd [#allocation3], 4294967040 }
   0xb   :  { %208 = dma.done.wait [#allocation6], 256  }
   0xc   :  { %209 = vsyncadd [#allocation6], 4294967040  ;;  %v49_v0 = vld [vmem:[#allocation2] sm:$0xff]  ;;  %v50_v1 = vld [vmem:[#allocation2 + $0x8] sm:$0xff]  ;;  %s216_s0 = smov [#allocation7]   ;;  %s78_s24 = sshll.u32 %s252_s2, 4  ;;  %s79_s24 = int_to_ptr.hbm [resolvable:$true] %s78_s24 }
   0xd   :  { %v51_v2 = vld [vmem:[#allocation5] sm:$0xff]  ;;  %v52_v3 = vld [vmem:[#allocation5 + $0x8] sm:$0xff]  ;;  %v55_v5 = vmul.f32 %v49_v0, %v49_v0  ;;  %v61_v7 = vmul.f32 %v50_v1, %v50_v1  ;;  %s76_s1 = sshll.u32 %s216_s0, 4  ;;  %s217_s25 = smov [#allocation8]   ;;  %s77_s1 = int_to_ptr.vmem [resolvable:$true] %s76_s1 }
   0xe   :  { %v53_v4 = vmul.f32 %v51_v2, %v49_v0  ;;  %v57_v6 = vmul.f32 %v51_v2, %v51_v2  ;;  %v59_v8 = vmul.f32 %v52_v3, %v50_v1  ;;  %v63_v10 = vmul.f32 %v52_v3, %v52_v3  ;;  %s87_s26 = sshll.u32 %s217_s25, 4  ;;  %s89_s29 = sshll.u32 %s253_s3, 4  ;;  %s88_s26 = int_to_ptr.vmem [resolvable:$true] %s87_s26  ;;  %s90_s29 = int_to_ptr.hbm [resolvable:$true] %s89_s29 }
  0x10   :  { %v58_v9 = vadd.f32 %v57_v6, %v55_v5  ;;  %v60_v11 = vadd.f32 %v59_v8, %v53_v4 }
  0x12   :  { %v62_v12 = vadd.f32 %v61_v7, %v58_v9  ;;  %67 = vst [vmem:[#allocation7] sm:$0xff] %v60_v11 }
  0x13   :  { %81 = dma.vmem_to_hbm [thread:$0]  %s77_s1, 128, %s79_s24, [#allocation4]  }
  0x14   :  { %v64_v13 = vadd.f32 %v63_v10, %v62_v12 }
  0x16   :  { %70 = vst [vmem:[#allocation8] sm:$0xff] %v64_v13 }
  0x17   :  { %92 = dma.vmem_to_hbm [thread:$0]  %s88_s26, 128, %s90_s29, [#allocation9]  }
  0x18   :  { %210 = dma.done.wait [#allocation4], 128  }
  0x19   :  { %211 = vsyncadd [#allocation4], 4294967168 }
  0x1a   :  { %212 = dma.done.wait [#allocation9], 128  }
  0x1b   :  { %213 = vsyncadd [#allocation9], 4294967168 }
  0x1c   :  { %101 = vsyncpa [#allocation3], 1 }
  0x1d   :  { %102 = vsyncpa [#allocation6], 1 }
  0x1e   :  { %103 = vsyncpa [#allocation4], 1 }
  0x1f   :  { %104 = vsyncpa [#allocation9], 1 }

</bundles_post_ra>
